<compile_context>
chip_gen: v7x
topology: tpu7x:2x2x1
jax: 0.10.0
libtpu: 0.0.40
codegen_flags: <defaults>
</compile_context>

<pallas_src>
import jax
import jax.numpy as jnp
from jax.experimental import pallas as pl
from jax.experimental.pallas import tpu as pltpu


# ---------------- helpers ----------------

def _round_up(n, m):
    return ((n + m - 1) // m) * m


def _pick_block_unroll(nb, hp):
    """Residual blocks per grid step (amortize per-step overhead), keeping the
    streamed (U, 2, Hp, Hp) bf16 weight block <= 8 MiB."""
    for u in (4, 2, 1):
        if nb % u == 0 and u * 2 * hp * hp * 2 <= (8 << 20):
            return u
    return 1


def _pick_row_chunks(tile_b):
    """Split the batch tile into row chunks (multiples of 16 rows, bf16 sublane
    packing) so chunk j's matmul overlaps chunk j-1's tanh."""
    for nc in (4, 2):
        if tile_b % (nc * 16) == 0:
            return nc
    return 1


# ---------------- fused kernel ----------------

def _make_kernel(n_blocks_per_step, n_row_chunks, chunk_rows):
    def kernel(
        x_ref,        # (TILE_B, Ip)        f32   input tile (batch-indexed)
        in_w_ref,     # (Ip, Hp)            bf16  resident
        in_b_ref,     # (1, Hp)             f32   resident
        w_ref,        # (U, 2, Hp, Hp)      bf16  streamed residual-block weights
        b1_ref,       # (nb, 1, Hp)         f32   resident bias stack (fc1)
        b2_ref,       # (nb, 1, Hp)         f32   resident bias stack (fc2)
        out_w_ref,    # (Hp, Op)            bf16  resident
        out_b_ref,    # (1, Op)             f32   resident
        o_ref,        # (TILE_B, Op)        f32   output tile (batch-indexed)
        x_scr,        # (TILE_B, Hp)        f32   VMEM-resident activation carry
    ):
        d = pl.program_id(1)
        last = pl.num_programs(1) - 1

        # --- input linear, first depth step of each batch tile ---
        @pl.when(d == 0)
        def _():
            x_scr[...] = (
                jnp.dot(x_ref[...].astype(jnp.bfloat16), in_w_ref[...],
                        preferred_element_type=jnp.float32)
                + in_b_ref[...]
            )

        # --- U residual blocks per grid step, row-chunked batch tile ---
        for u in range(n_blocks_per_step):
            db = d * n_blocks_per_step + u          # global block index
            b1 = b1_ref[db]                          # (1, Hp)
            b2 = b2_ref[db]                          # (1, Hp)
            w1 = w_ref[u, 0]                         # (Hp, Hp) bf16
            w2 = w_ref[u, 1]                         # (Hp, Hp) bf16
            for j in range(n_row_chunks):
                rows = pl.ds(j * chunk_rows, chunk_rows)
                xj = x_scr[rows, :]
                h = jnp.tanh(
                    jnp.dot(xj.astype(jnp.bfloat16), w1,
                            preferred_element_type=jnp.float32)
                    + b1
                )
                x_scr[rows, :] = jnp.tanh(
                    jnp.dot(h.astype(jnp.bfloat16), w2,
                            preferred_element_type=jnp.float32)
                    + b2
                    + xj
                )

        # --- output linear, last depth step of each batch tile ---
        @pl.when(d == last)
        def _():
            o_ref[...] = (
                jnp.dot(x_scr[...].astype(jnp.bfloat16), out_w_ref[...],
                        preferred_element_type=jnp.float32)
                + out_b_ref[...]
            ).astype(o_ref.dtype)

    return kernel


# ---------------- parameter init (matches PyTorch __init__ stds) ----------------

def init_resnet_params(key, input_size, hidden_size, output_size, depth):
    params = {}
    k = key

    def normal(k, shape, std):
        return std * jax.random.normal(k, shape, dtype=jnp.float32)

    k, k1, k2 = jax.random.split(k, 3)
    params["in_w"] = normal(k1, (input_size, hidden_size), 0.001)
    params["in_b"] = normal(k2, (1, hidden_size), 0.001)

    blocks = []
    for _ in range(depth - 1):
        k, k1, k2, k3, k4 = jax.random.split(k, 5)
        blocks.append(
            dict(
                w1=normal(k1, (hidden_size, hidden_size), 0.1),
                b1=normal(k2, (1, hidden_size), 0.1),
                w2=normal(k3, (hidden_size, hidden_size), 0.1),
                b2=normal(k4, (1, hidden_size), 0.1),
            )
        )
    params["blocks"] = blocks

    k, k1, k2 = jax.random.split(k, 3)
    params["out_w"] = normal(k1, (hidden_size, output_size), 0.001)
    params["out_b"] = normal(k2, (1, output_size), 0.001)
    return params


# ---------------- padding / stacking for the fused kernel ----------------

def prepare_fused_params(params, input_size, hidden_size, output_size):
    """Zero-pad feature dims to 128 lanes, fuse per-block fc1/fc2 weights into
    one (nb, 2, Hp, Hp) stack, keep bias stacks separate (VMEM-resident),
    pre-cast matmul weights to bf16 (biases stay f32)."""
    I, H, O = input_size, hidden_size, output_size
    Ip, Hp, Op = _round_up(I, 128), _round_up(H, 128), _round_up(O, 128)

    def pad2(a, rows, cols):
        return jnp.pad(a, ((0, rows - a.shape[0]), (0, cols - a.shape[1])))

    blocks = params["blocks"]
    assert len(blocks) >= 1, "fused path needs depth >= 2"
    # TODO(synk): depth == 1 (no residual blocks) would need a separate tiny
    # two-linear kernel; not required for this module's typical use.

    w_stack = jnp.stack(
        [jnp.stack([pad2(b["w1"], Hp, Hp), pad2(b["w2"], Hp, Hp)]) for b in blocks]
    ).astype(jnp.bfloat16)                                        # (nb, 2, Hp, Hp)
    b1_stack = jnp.stack([pad2(b["b1"], 1, Hp) for b in blocks])  # (nb, 1, Hp)
    b2_stack = jnp.stack([pad2(b["b2"], 1, Hp) for b in blocks])  # (nb, 1, Hp)

    return {
        "in_w": pad2(params["in_w"], Ip, Hp).astype(jnp.bfloat16),
        "in_b": pad2(params["in_b"], 1, Hp),
        "w": w_stack,
        "b1": b1_stack,
        "b2": b2_stack,
        "out_w": pad2(params["out_w"], Hp, Op).astype(jnp.bfloat16),
        "out_b": pad2(params["out_b"], 1, Op),
        "dims": (I, H, O, Ip, Hp, Op),
    }


# ---------------- fused forward (single pallas_call) ----------------

def resnet_forward(fused, x, *, batch_tile=512):
    I, H, O, Ip, Hp, Op = fused["dims"]
    nb = fused["w"].shape[0]          # number of residual blocks = depth - 1
    B = x.shape[0]

    # Batch tiling: TILE_B multiple of 16 (bf16 sublane packing), bounded VMEM.
    tile_b = max(16, _round_up(min(batch_tile, _round_up(B, 16)), 16))
    Bp = _round_up(B, tile_b)
    n_btiles = Bp // tile_b

    U = _pick_block_unroll(nb, Hp)            # residual blocks per grid step
    n_dsteps = nb // U
    n_chunks = _pick_row_chunks(tile_b)       # intra-step row chunking
    chunk_rows = tile_b // n_chunks

    x_p = jnp.pad(x, ((0, Bp - B), (0, Ip - x.shape[1])))

    # Constant-index, VMEM-resident operands: single-buffered (no pointless
    # double-buffering of blocks that never change).
    def resident(shape):
        n = len(shape)
        return pl.BlockSpec(shape, lambda i, d, _n=n: (0,) * _n,
                            pipeline_mode=pl.Buffered(1))

    in_specs = [
        pl.BlockSpec((tile_b, Ip), lambda i, d: (i, 0)),           # x (batch-indexed)
        resident((Ip, Hp)),                                        # in_w
        resident((1, Hp)),                                         # in_b
        pl.BlockSpec((U, 2, Hp, Hp), lambda i, d: (d, 0, 0, 0)),   # fused w1/w2 stack
        resident((nb, 1, Hp)),                                     # b1 stack (resident)
        resident((nb, 1, Hp)),                                     # b2 stack (resident)
        resident((Hp, Op)),                                        # out_w
        resident((1, Op)),                                         # out_b
    ]
    out_spec = pl.BlockSpec((tile_b, Op), lambda i, d: (i, 0))

    # Explicit VMEM budget from the actual buffers (+50% headroom, 16..64 MiB).
    vmem_bytes = (
        2 * (U * 2 * Hp * Hp * 2)            # double-buffered streamed weights (bf16)
        + 2 * (tile_b * Ip * 4)              # input tile (double-buffered)
        + 2 * (tile_b * Op * 4)              # output tile (double-buffered)
        + tile_b * Hp * 4                    # activation scratch
        + Ip * Hp * 2 + Hp * Op * 2          # resident in/out weights (bf16)
        + 8 * Hp * 4 + 8 * Op * 4            # in_b / out_b (sublane-padded)
        + 2 * nb * 8 * Hp * 4                # resident bias stacks
    )
    vmem_limit = int(min(max(int(vmem_bytes * 1.5) + (2 << 20), 16 << 20), 64 << 20))

    flops = 2 * Bp * (Ip * Hp + nb * 2 * Hp * Hp + Hp * Op)
    transcendentals = 2 * nb * Bp * Hp
    bytes_accessed = (
        x_p.size * 4
        + n_btiles * fused["w"].size * 2          # weights re-streamed per batch tile
        + fused["in_w"].size * 2 + fused["out_w"].size * 2
        + (fused["in_b"].size + fused["b1"].size
           + fused["b2"].size + fused["out_b"].size) * 4
        + Bp * Op * 4
    )

    kernel = _make_kernel(U, n_chunks, chunk_rows)

    out_p = pl.pallas_call(
        kernel,
        out_shape=jax.ShapeDtypeStruct((Bp, Op), jnp.float32),
        grid_spec=pltpu.PrefetchScalarGridSpec(
            num_scalar_prefetch=0,
            grid=(n_btiles, n_dsteps),
            in_specs=in_specs,
            out_specs=out_spec,
            scratch_shapes=[pltpu.VMEM((tile_b, Hp), jnp.float32)],
        ),
        compiler_params=pltpu.CompilerParams(
            # batch tiles independent (megacore-splittable); depth is the carry axis
            dimension_semantics=("parallel", "arbitrary"),
            vmem_limit_bytes=vmem_limit,
        ),
        cost_estimate=pl.CostEstimate(
            flops=flops,
            transcendentals=transcendentals,
            bytes_accessed=bytes_accessed,
        ),
    )(
        x_p,
        fused["in_w"], fused["in_b"],
        fused["w"], fused["b1"], fused["b2"],
        fused["out_w"], fused["out_b"],
    )
    return out_p[:B, :O]


# ---------------- references for verification ----------------

def resnet_ref_f32(params, x):
    x = x @ params["in_w"] + params["in_b"]
    for blk in params["blocks"]:
        h = jnp.tanh(x @ blk["w1"] + blk["b1"])
        x = jnp.tanh(h @ blk["w2"] + blk["b2"] + x)
    return x @ params["out_w"] + params["out_b"]


def resnet_ref_bf16(params, x):
    # Matches the kernel's numerics: bf16 dot operands, f32 accumulation.
    def dot(a, b):
        return jnp.dot(a.astype(jnp.bfloat16), b.astype(jnp.bfloat16),
                       preferred_element_type=jnp.float32)

    x = dot(x, params["in_w"]) + params["in_b"]
    for blk in params["blocks"]:
        h = jnp.tanh(dot(x, blk["w1"]) + blk["b1"])
        x = jnp.tanh(dot(h, blk["w2"]) + blk["b2"] + x)
    return dot(x, params["out_w"]) + params["out_b"]


if __name__ == "__main__":
    key = jax.random.PRNGKey(0)
    k_params, k_x = jax.random.split(key)

    batch = 8
    input_size = 8
    hidden_size = 32
    output_size = 4
    depth = 3

    params = init_resnet_params(k_params, input_size, hidden_size, output_size, depth)
    fused = prepare_fused_params(params, input_size, hidden_size, output_size)
    x = jax.random.normal(k_x, (batch, input_size), dtype=jnp.float32)

    out = jax.block_until_ready(resnet_forward(fused, x))

    ref_bf16 = resnet_ref_bf16(params, x)   # same numerics as kernel
    ref_f32 = resnet_ref_f32(params, x)     # pure f32 sanity check

    assert out.shape == (batch, output_size)
    assert jnp.allclose(out, ref_bf16, atol=5e-5, rtol=1e-3), "mismatch vs bf16 reference"
    assert jnp.allclose(out, ref_f32, atol=1e-3, rtol=5e-2), "mismatch vs f32 reference"
    print("KERNEL_OK")
</pallas_src>

<mosaic_0001>
module attributes {stable_mosaic.version = 11 : i64} {
  func.func @kernel(%arg0: i32, %arg1: i32, %arg2: memref<16x128xf32, #tpu.memory_space<vmem>>, %arg3: memref<128x128xbf16, #tpu.memory_space<vmem>>, %arg4: memref<1x128xf32, #tpu.memory_space<vmem>>, %arg5: memref<2x2x128x128xbf16, #tpu.memory_space<vmem>>, %arg6: memref<2x1x128xf32, #tpu.memory_space<vmem>>, %arg7: memref<2x1x128xf32, #tpu.memory_space<vmem>>, %arg8: memref<128x128xbf16, #tpu.memory_space<vmem>>, %arg9: memref<1x128xf32, #tpu.memory_space<vmem>>, %arg10: memref<16x128xf32, #tpu.memory_space<vmem>>, %arg11: memref<16x128xf32, #tpu.memory_space<vmem>>) attributes {dimension_semantics = [#tpu.dimension_semantics<parallel>, #tpu.dimension_semantics<arbitrary>], iteration_bounds = array<i64: 1, 1>, scalar_prefetch = 0 : i64, scratch_operands = 1 : i64, tpu.core_type = #tpu.core_type<tc>, window_params = [{transform_indices = @transform_0, window_bounds = array<i64: 16, 128>}, {pipeline_mode = #tpu.pipeline_mode<synchronous>, transform_indices = @transform_1, window_bounds = array<i64: 128, 128>}, {pipeline_mode = #tpu.pipeline_mode<synchronous>, transform_indices = @transform_2, window_bounds = array<i64: 1, 128>}, {transform_indices = @transform_3, window_bounds = array<i64: 2, 2, 128, 128>}, {pipeline_mode = #tpu.pipeline_mode<synchronous>, transform_indices = @transform_4, window_bounds = array<i64: 2, 1, 128>}, {pipeline_mode = #tpu.pipeline_mode<synchronous>, transform_indices = @transform_5, window_bounds = array<i64: 2, 1, 128>}, {pipeline_mode = #tpu.pipeline_mode<synchronous>, transform_indices = @transform_6, window_bounds = array<i64: 128, 128>}, {pipeline_mode = #tpu.pipeline_mode<synchronous>, transform_indices = @transform_7, window_bounds = array<i64: 1, 128>}, {transform_indices = @transform_8, window_bounds = array<i64: 16, 128>}]} {
    %c0_i32 = arith.constant 0 : i32
    %0 = arith.cmpi eq, %arg1, %c0_i32 : i32
    %1 = arith.extui %0 : i1 to i32
    %c0_i32_0 = arith.constant 0 : i32
    %2 = arith.cmpi ne, %1, %c0_i32_0 : i32
    scf.if %2 {
      %c0_38 = arith.constant 0 : index
      %c0_39 = arith.constant 0 : index
      %56 = vector.load %arg2[%c0_38, %c0_39] : memref<16x128xf32, #tpu.memory_space<vmem>>, vector<16x128xf32>
      %57 = arith.truncf %56 : vector<16x128xf32> to vector<16x128xbf16>
      %c0_40 = arith.constant 0 : index
      %c0_41 = arith.constant 0 : index
      %58 = vector.load %arg3[%c0_40, %c0_41] : memref<128x128xbf16, #tpu.memory_space<vmem>>, vector<128x128xbf16>
      %cst_42 = arith.constant dense<0.000000e+00> : vector<16x128xf32>
      %59 = tpu.matmul %57, %58, %cst_42 {dimension_numbers = #tpu.dot_dimension_numbers<[1], [0], [0], [1], [0, 0, 1, 1], [], []>} : vector<16x128xbf16>, vector<128x128xbf16>, vector<16x128xf32> -> vector<16x128xf32>
      %c0_43 = arith.constant 0 : index
      %c0_44 = arith.constant 0 : index
      %60 = vector.load %arg4[%c0_43, %c0_44] : memref<1x128xf32, #tpu.memory_space<vmem>>, vector<1x128xf32>
      %61 = vector.broadcast %60 : vector<1x128xf32> to vector<16x128xf32>
      %62 = arith.addf %59, %61 : vector<16x128xf32>
      %c0_45 = arith.constant 0 : index
      %c0_46 = arith.constant 0 : index
      %63 = vector.load %arg11[%c0_45, %c0_46] : memref<16x128xf32, #tpu.memory_space<vmem>>, vector<16x128xf32>
      tpu.vector_store %arg11[%c0_45, %c0_46], %62 {strides = array<i32>} : memref<16x128xf32, #tpu.memory_space<vmem>>, vector<16x128xf32>,
    } else {
    }
    %c2_i32 = arith.constant 2 : i32
    %3 = arith.muli %arg1, %c2_i32 : i32
    %c0_i32_1 = arith.constant 0 : i32
    %4 = arith.addi %3, %c0_i32_1 : i32
    %5 = arith.index_cast %4 : i32 to index
    %c0 = arith.constant 0 : index
    %c0_2 = arith.constant 0 : index
    %6 = vector.load %arg6[%5, %c0, %c0_2] : memref<2x1x128xf32, #tpu.memory_space<vmem>>, vector<1x1x128xf32>
    %7 = vector.shape_cast %6 : vector<1x1x128xf32> to vector<1x128xf32>
    %8 = arith.index_cast %4 : i32 to index
    %c0_3 = arith.constant 0 : index
    %c0_4 = arith.constant 0 : index
    %9 = vector.load %arg7[%8, %c0_3, %c0_4] : memref<2x1x128xf32, #tpu.memory_space<vmem>>, vector<1x1x128xf32>
    %10 = vector.shape_cast %9 : vector<1x1x128xf32> to vector<1x128xf32>
    %c0_5 = arith.constant 0 : index
    %c0_6 = arith.constant 0 : index
    %c0_7 = arith.constant 0 : index
    %c0_8 = arith.constant 0 : index
    %11 = vector.load %arg5[%c0_5, %c0_6, %c0_7, %c0_8] : memref<2x2x128x128xbf16, #tpu.memory_space<vmem>>, vector<1x1x128x128xbf16>
    %12 = vector.shape_cast %11 : vector<1x1x128x128xbf16> to vector<128x128xbf16>
    %c0_9 = arith.constant 0 : index
    %c1 = arith.constant 1 : index
    %c0_10 = arith.constant 0 : index
    %c0_11 = arith.constant 0 : index
    %13 = vector.load %arg5[%c0_9, %c1, %c0_10, %c0_11] : memref<2x2x128x128xbf16, #tpu.memory_space<vmem>>, vector<1x1x128x128xbf16>
    %14 = vector.shape_cast %13 : vector<1x1x128x128xbf16> to vector<128x128xbf16>
    %c0_12 = arith.constant 0 : index
    %c0_13 = arith.constant 0 : index
    %15 = vector.load %arg11[%c0_12, %c0_13] : memref<16x128xf32, #tpu.memory_space<vmem>>, vector<16x128xf32>
    %16 = arith.truncf %15 : vector<16x128xf32> to vector<16x128xbf16>
    %cst = arith.constant dense<0.000000e+00> : vector<16x128xf32>
    %17 = tpu.matmul %16, %12, %cst {dimension_numbers = #tpu.dot_dimension_numbers<[1], [0], [0], [1], [0, 0, 1, 1], [], []>} : vector<16x128xbf16>, vector<128x128xbf16>, vector<16x128xf32> -> vector<16x128xf32>
    %18 = vector.broadcast %7 : vector<1x128xf32> to vector<16x128xf32>
    %19 = arith.addf %17, %18 : vector<16x128xf32>
    %20 = math.tanh %19 : vector<16x128xf32>
    %21 = arith.truncf %20 : vector<16x128xf32> to vector<16x128xbf16>
    %cst_14 = arith.constant dense<0.000000e+00> : vector<16x128xf32>
    %22 = tpu.matmul %21, %14, %cst_14 {dimension_numbers = #tpu.dot_dimension_numbers<[1], [0], [0], [1], [0, 0, 1, 1], [], []>} : vector<16x128xbf16>, vector<128x128xbf16>, vector<16x128xf32> -> vector<16x128xf32>
    %23 = vector.broadcast %10 : vector<1x128xf32> to vector<16x128xf32>
    %24 = arith.addf %22, %23 : vector<16x128xf32>
    %25 = arith.addf %24, %15 : vector<16x128xf32>
    %26 = math.tanh %25 : vector<16x128xf32>
    %c0_15 = arith.constant 0 : index
    %c0_16 = arith.constant 0 : index
    %27 = vector.load %arg11[%c0_15, %c0_16] : memref<16x128xf32, #tpu.memory_space<vmem>>, vector<16x128xf32>
    tpu.vector_store %arg11[%c0_15, %c0_16], %26 {strides = array<i32>} : memref<16x128xf32, #tpu.memory_space<vmem>>, vector<16x128xf32>,
    %c2_i32_17 = arith.constant 2 : i32
    %28 = arith.muli %arg1, %c2_i32_17 : i32
    %c1_i32 = arith.constant 1 : i32
    %29 = arith.addi %28, %c1_i32 : i32
    %30 = arith.index_cast %29 : i32 to index
    %c0_18 = arith.constant 0 : index
    %c0_19 = arith.constant 0 : index
    %31 = vector.load %arg6[%30, %c0_18, %c0_19] : memref<2x1x128xf32, #tpu.memory_space<vmem>>, vector<1x1x128xf32>
    %32 = vector.shape_cast %31 : vector<1x1x128xf32> to vector<1x128xf32>
    %33 = arith.index_cast %29 : i32 to index
    %c0_20 = arith.constant 0 : index
    %c0_21 = arith.constant 0 : index
    %34 = vector.load %arg7[%33, %c0_20, %c0_21] : memref<2x1x128xf32, #tpu.memory_space<vmem>>, vector<1x1x128xf32>
    %35 = vector.shape_cast %34 : vector<1x1x128xf32> to vector<1x128xf32>
    %c1_22 = arith.constant 1 : index
    %c0_23 = arith.constant 0 : index
    %c0_24 = arith.constant 0 : index
    %c0_25 = arith.constant 0 : index
    %36 = vector.load %arg5[%c1_22, %c0_23, %c0_24, %c0_25] : memref<2x2x128x128xbf16, #tpu.memory_space<vmem>>, vector<1x1x128x128xbf16>
    %37 = vector.shape_cast %36 : vector<1x1x128x128xbf16> to vector<128x128xbf16>
    %c1_26 = arith.constant 1 : index
    %c1_27 = arith.constant 1 : index
    %c0_28 = arith.constant 0 : index
    %c0_29 = arith.constant 0 : index
    %38 = vector.load %arg5[%c1_26, %c1_27, %c0_28, %c0_29] : memref<2x2x128x128xbf16, #tpu.memory_space<vmem>>, vector<1x1x128x128xbf16>
    %39 = vector.shape_cast %38 : vector<1x1x128x128xbf16> to vector<128x128xbf16>
    %c0_30 = arith.constant 0 : index
    %c0_31 = arith.constant 0 : index
    %40 = vector.load %arg11[%c0_30, %c0_31] : memref<16x128xf32, #tpu.memory_space<vmem>>, vector<16x128xf32>
    %41 = arith.truncf %40 : vector<16x128xf32> to vector<16x128xbf16>
    %cst_32 = arith.constant dense<0.000000e+00> : vector<16x128xf32>
    %42 = tpu.matmul %41, %37, %cst_32 {dimension_numbers = #tpu.dot_dimension_numbers<[1], [0], [0], [1], [0, 0, 1, 1], [], []>} : vector<16x128xbf16>, vector<128x128xbf16>, vector<16x128xf32> -> vector<16x128xf32>
    %43 = vector.broadcast %32 : vector<1x128xf32> to vector<16x128xf32>
    %44 = arith.addf %42, %43 : vector<16x128xf32>
    %45 = math.tanh %44 : vector<16x128xf32>
    %46 = arith.truncf %45 : vector<16x128xf32> to vector<16x128xbf16>
    %cst_33 = arith.constant dense<0.000000e+00> : vector<16x128xf32>
    %47 = tpu.matmul %46, %39, %cst_33 {dimension_numbers = #tpu.dot_dimension_numbers<[1], [0], [0], [1], [0, 0, 1, 1], [], []>} : vector<16x128xbf16>, vector<128x128xbf16>, vector<16x128xf32> -> vector<16x128xf32>
    %48 = vector.broadcast %35 : vector<1x128xf32> to vector<16x128xf32>
    %49 = arith.addf %47, %48 : vector<16x128xf32>
    %50 = arith.addf %49, %40 : vector<16x128xf32>
    %51 = math.tanh %50 : vector<16x128xf32>
    %c0_34 = arith.constant 0 : index
    %c0_35 = arith.constant 0 : index
    %52 = vector.load %arg11[%c0_34, %c0_35] : memref<16x128xf32, #tpu.memory_space<vmem>>, vector<16x128xf32>
    tpu.vector_store %arg11[%c0_34, %c0_35], %51 {strides = array<i32>} : memref<16x128xf32, #tpu.memory_space<vmem>>, vector<16x128xf32>,
    %c0_i32_36 = arith.constant 0 : i32
    %53 = arith.cmpi eq, %arg1, %c0_i32_36 : i32
    %54 = arith.extui %53 : i1 to i32
    %c0_i32_37 = arith.constant 0 : i32
    %55 = arith.cmpi ne, %54, %c0_i32_37 : i32
    scf.if %55 {
      %c0_38 = arith.constant 0 : index
      %c0_39 = arith.constant 0 : index
      %56 = vector.load %arg11[%c0_38, %c0_39] : memref<16x128xf32, #tpu.memory_space<vmem>>, vector<16x128xf32>
      %57 = arith.truncf %56 : vector<16x128xf32> to vector<16x128xbf16>
      %c0_40 = arith.constant 0 : index
      %c0_41 = arith.constant 0 : index
      %58 = vector.load %arg8[%c0_40, %c0_41] : memref<128x128xbf16, #tpu.memory_space<vmem>>, vector<128x128xbf16>
      %cst_42 = arith.constant dense<0.000000e+00> : vector<16x128xf32>
      %59 = tpu.matmul %57, %58, %cst_42 {dimension_numbers = #tpu.dot_dimension_numbers<[1], [0], [0], [1], [0, 0, 1, 1], [], []>} : vector<16x128xbf16>, vector<128x128xbf16>, vector<16x128xf32> -> vector<16x128xf32>
      %c0_43 = arith.constant 0 : index
      %c0_44 = arith.constant 0 : index
      %60 = vector.load %arg9[%c0_43, %c0_44] : memref<1x128xf32, #tpu.memory_space<vmem>>, vector<1x128xf32>
      %61 = vector.broadcast %60 : vector<1x128xf32> to vector<16x128xf32>
      %62 = arith.addf %59, %61 : vector<16x128xf32>
      %c0_45 = arith.constant 0 : index
      %c0_46 = arith.constant 0 : index
      %63 = vector.load %arg10[%c0_45, %c0_46] : memref<16x128xf32, #tpu.memory_space<vmem>>, vector<16x128xf32>
      tpu.vector_store %arg10[%c0_45, %c0_46], %62 {strides = array<i32>} : memref<16x128xf32, #tpu.memory_space<vmem>>, vector<16x128xf32>,
    } else {
    }
    return
  }
  func.func @transform_0(%arg0: i32, %arg1: i32) -> (i32, i32) {
    %c0_i32 = arith.constant 0 : i32
    %c0_i32_0 = arith.constant 0 : i32
    return %arg0, %c0_i32 : i32, i32
  }
  func.func @transform_1(%arg0: i32, %arg1: i32) -> (i32, i32) {
    %c0_i32 = arith.constant 0 : i32
    %c0_i32_0 = arith.constant 0 : i32
    %c0_i32_1 = arith.constant 0 : i32
    return %c0_i32, %c0_i32_0 : i32, i32
  }
  func.func @transform_2(%arg0: i32, %arg1: i32) -> (i32, i32) {
    %c0_i32 = arith.constant 0 : i32
    %c0_i32_0 = arith.constant 0 : i32
    %c0_i32_1 = arith.constant 0 : i32
    return %c0_i32, %c0_i32_0 : i32, i32
  }
  func.func @transform_3(%arg0: i32, %arg1: i32) -> (i32, i32, i32, i32) {
    %c0_i32 = arith.constant 0 : i32
    %c0_i32_0 = arith.constant 0 : i32
    %c0_i32_1 = arith.constant 0 : i32
    %c0_i32_2 = arith.constant 0 : i32
    return %arg1, %c0_i32, %c0_i32_0, %c0_i32_1 : i32, i32, i32, i32
  }
  func.func @transform_4(%arg0: i32, %arg1: i32) -> (i32, i32, i32) {
    %c0_i32 = arith.constant 0 : i32
    %c0_i32_0 = arith.constant 0 : i32
    %c0_i32_1 = arith.constant 0 : i32
    %c0_i32_2 = arith.constant 0 : i32
    return %c0_i32, %c0_i32_0, %c0_i32_1 : i32, i32, i32
  }
  func.func @transform_5(%arg0: i32, %arg1: i32) -> (i32, i32, i32) {
    %c0_i32 = arith.constant 0 : i32
    %c0_i32_0 = arith.constant 0 : i32
    %c0_i32_1 = arith.constant 0 : i32
    %c0_i32_2 = arith.constant 0 : i32
    return %c0_i32, %c0_i32_0, %c0_i32_1 : i32, i32, i32
  }
  func.func @transform_6(%arg0: i32, %arg1: i32) -> (i32, i32) {
    %c0_i32 = arith.constant 0 : i32
    %c0_i32_0 = arith.constant 0 : i32
    %c0_i32_1 = arith.constant 0 : i32
    return %c0_i32, %c0_i32_0 : i32, i32
  }
  func.func @transform_7(%arg0: i32, %arg1: i32) -> (i32, i32) {
    %c0_i32 = arith.constant 0 : i32
    %c0_i32_0 = arith.constant 0 : i32
    %c0_i32_1 = arith.constant 0 : i32
    return %c0_i32, %c0_i32_0 : i32, i32
  }
  func.func @transform_8(%arg0: i32, %arg1: i32) -> (i32, i32) {
    %c0_i32 = arith.constant 0 : i32
    %c0_i32_0 = arith.constant 0 : i32
    return %arg0, %c0_i32 : i32, i32
  }
}

</mosaic_0001>

<bundles_post_ra>
// kernel: tpu_custom_call.1
= control target key start
LH: loop header
LB: loop body
LE: loop exit
PB: predicated region body
PF: predicated region fallthrough
CT: control target
= control target key end

     0   :  { %13 = vsyncpa [#allocation4], 0  ;;  %s1476_s0 = inlined_call_operand.hbm [shape: f32[16,128], index: 0, kind: input, shape index: {}]   ;;  %s1477_s1 = inlined_call_operand.hbm [shape: bf16[128,128], index: 1, kind: input, shape index: {}]   ;;  %s1478_s2 = inlined_call_operand.vmem [shape: f32[1,128], index: 2, kind: input, shape index: {}]   ;;  %s1479_s3 = inlined_call_operand.hbm [shape: bf16[2,2,128,128], index: 3, kind: input, shape index: {}]   ;;  %s1480_s4 = inlined_call_operand.vmem [shape: f32[2,1,128], index: 4, kind: input, shape index: {}]   ;;  %s1481_s5 = inlined_call_operand.vmem [shape: f32[2,1,128], index: 5, kind: input, shape index: {}]   ;;  %s1482_s6 = inlined_call_operand.hbm [shape: bf16[128,128], index: 6, kind: input, shape index: {}]   ;;  %s1483_s7 = inlined_call_operand.vmem [shape: f32[1,128], index: 7, kind: input, shape index: {}]   ;;  %s1484_s8 = inlined_call_operand.hbm [shape: f32[16,128], index: 8, kind: output, shape index: {}]  }
   0x1   :  { %14 = vsyncpa [#allocation7], 0 }
   0x2   :  { %15 = vsyncpa [#allocation10], 0 }
   0x3   :  { %16 = vsyncpa [#allocation5], 0  ;;  %s1252_s27 = smov [#allocation6]   ;;  %s1134_s9 = scalar_lea.hbm %s1477_s1, 1024 }
   0x4   :  { %s34_s28 = sshll.u32 %s1252_s27, 4  ;;  %p1135_p0 = scmp.ne.s32.totalorder %s1477_s1, %s1134_s9  ;;  %s35_s28 = int_to_ptr.vmem [resolvable:$true] %s34_s28 }
   0x5   :  { %p1138_p1 = scmp.lt.u32.totalorder %s1134_s9, %s1477_s1 }
   0x7   :  { %p1140_p2 = pnand %p1138_p1, %p1135_p0 }
   0x9   :  { %1143 = shalt.err (!%p1140_p2)
}
   0xa   :  { %s1144_s14 = scalar_lea.vmem %s35_s28, 1024  ;;  %p1149_p4 = scmp.lt.s32.totalorder %s35_s28, %s35_s28 }
   0xb   :  { %p1145_p3 = scmp.ne.s32.totalorder %s35_s28, %s1144_s14  ;;  %p1150_p5 = scmp.lt.s32.totalorder %s1144_s14, %s1144_s14 }
   0xd   :  { %p1151_p6 = por %p1150_p5, %p1149_p4 }
   0xf   :  { %p1152_p7 = pnand %p1151_p6, %p1145_p3 }
  0x11   :  { %1155 = shalt.err (!%p1152_p7)
}
  0x12   :  { %s1253_s15 = smov 64   ;;  %s1254_s16 = smov 4  }
  0x13   :  { %40 = dma.hbm_to_vmem [thread:$0]  %s1477_s1, 1024, %s35_s28, [#allocation7], %s1253_s15, %s1253_s15, %s1254_s16  }
  0x14   :  { %s1255_s19 = smov [#allocation3]   ;;  %s1156_s23 = scalar_lea.hbm %s1476_s0, 256 }
  0x15   :  { %s22_s20 = sshll.u32 %s1255_s19, 4  ;;  %p1157_p8 = scmp.ne.s32.totalorder %s1476_s0, %s1156_s23  ;;  %s23_s20 = int_to_ptr.vmem [resolvable:$true] %s22_s20 }
  0x16   :  { %p1160_p9 = scmp.lt.u32.totalorder %s1156_s23, %s1476_s0 }
  0x18   :  { %p1162_p10 = pnand %p1160_p9, %p1157_p8 }
  0x1a   :  { %1165 = shalt.err (!%p1162_p10)
}
  0x1b   :  { %s1166_s29 = scalar_lea.vmem %s23_s20, 256  ;;  %p1171_p12 = scmp.lt.s32.totalorder %s23_s20, %s23_s20 }
  0x1c   :  { %p1167_p11 = scmp.ne.s32.totalorder %s23_s20, %s1166_s29  ;;  %p1172_p13 = scmp.lt.s32.totalorder %s1166_s29, %s1166_s29 }
  0x1e   :  { %p1173_p0 = por %p1172_p13, %p1171_p12 }
  0x20   :  { %p1174_p1 = pnand %p1173_p0, %p1167_p11 }
  0x22   :  { %1177 = shalt.err (!%p1174_p1)
}
  0x23   :  { %s1256_s1 = smov 128   ;;  %s1257_s28 = smov 8  }
  0x24   :  { %28 = dma.hbm_to_vmem [thread:$0]  %s1476_s0, 256, %s23_s20, [#allocation4], %s1256_s1, %s1256_s1, %s1257_s28  }
  0x25   :  { %s1258_s10 = smov [#allocation8]   ;;  %s1259_s12 = smov [#allocation9]  }
  0x26   :  { %s48_s11 = sshll.u32 %s1258_s10, 4  ;;  %s64_s13 = sshll.u32 %s1259_s12, 4  ;;  %s49_s11 = int_to_ptr.vmem [resolvable:$true] %s48_s11  ;;  %s1338_s13 = int_to_ptr.vmem [resolvable:$true] %s64_s13 }
  0x27   :  { %s1178_s18 = scalar_lea.hbm %s1479_s3, 4096 }
  0x28   :  { %p1179_p2 = scmp.ne.s32.totalorder %s1479_s3, %s1178_s18  ;;  %p1182_p3 = scmp.lt.u32.totalorder %s1178_s18, %s1479_s3 }
  0x2a   :  { %p1184_p4 = pnand %p1182_p3, %p1179_p2 }
  0x2c   :  { %1187 = shalt.err (!%p1184_p4)
}
  0x2d   :  { %s1188_s0 = scalar_lea.vmem %s49_s11, 4096  ;;  %p1193_p6 = scmp.lt.s32.totalorder %s49_s11, %s49_s11 }
  0x2e   :  { %p1189_p5 = scmp.ne.s32.totalorder %s49_s11, %s1188_s0  ;;  %p1194_p7 = scmp.lt.s32.totalorder %s1188_s0, %s1188_s0 }
  0x30   :  { %p1195_p8 = por %p1194_p7, %p1193_p6 }
  0x32   :  { %p1196_p9 = pnand %p1195_p8, %p1189_p5 }
  0x34   :  { %1199 = shalt.err (!%p1196_p9)
}
  0x35   :  { %54 = dma.hbm_to_vmem [thread:$0]  %s1479_s3, 4096, %s49_s11, [#allocation7], %s1253_s15, %s1253_s15, %s1254_s16  }
  0x36   :  { %s1200_s27 = scalar_lea.hbm %s1482_s6, 1024 }
  0x37   :  { %p1201_p10 = scmp.ne.s32.totalorder %s1482_s6, %s1200_s27  ;;  %p1204_p11 = scmp.lt.u32.totalorder %s1200_s27, %s1482_s6 }
  0x39   :  { %p1206_p12 = pnand %p1204_p11, %p1201_p10 }
  0x3b   :  { %1209 = shalt.err (!%p1206_p12)
}
  0x3c   :  { %s1210_s12 = scalar_lea.vmem %s1338_s13, 1024  ;;  %p1215_p0 = scmp.lt.s32.totalorder %s1338_s13, %s1338_s13 }
  0x3d   :  { %p1211_p13 = scmp.ne.s32.totalorder %s1338_s13, %s1210_s12  ;;  %p1216_p1 = scmp.lt.s32.totalorder %s1210_s12, %s1210_s12 }
  0x3f   :  { %p1217_p2 = por %p1216_p1, %p1215_p0 }
  0x41   :  { %p1218_p3 = pnand %p1217_p2, %p1211_p13 }
  0x43   :  { %1221 = shalt.err (!%p1218_p3)
}
  0x44   :  { %70 = dma.hbm_to_vmem [thread:$0]  %s1482_s6, 1024, %s1338_s13, [#allocation10], %s1253_s15, %s1253_s15, %s1254_s16  }
  0x45   :  { %1244 = dma.done.wait [#allocation4], 256  }
  0x46   :  { %1245 = vsyncadd [#allocation4], 4294967040 }
  0x47   :  { %1246 = dma.done.wait [#allocation7], 5120  }
  0x48   :  { %1247 = vsyncadd [#allocation7], 4294962176 }
  0x49   :  { %1248 = dma.done.wait [#allocation10], 1024  }
  0x4a   :  { %1249 = vsyncadd [#allocation10], 4294966272  ;;  %v1260_v0 = vmov 0.0   ;;  %vm1261_vm0 = vmmov 0   ;;  %v1070_v1 = vld [vmem:[#allocation6] sm:$0xff]   ;;  %v1071_v2 = vld [vmem:[#allocation6 + $0x8] sm:$0xff]  }
  0x4b   :  { %939 = vmatprep.subr.bf16.mxu0 %v1260_v0  ;;  %955 = vmatprep.mubr.msk.bf16.mxu0 %vm1261_vm0, %v1260_v0  ;;  %v1072_v3 = vld [vmem:[#allocation6 + $0x10] sm:$0xff]   ;;  %v1078_v4 = vld [vmem:[#allocation8] sm:$0xff]   ;;  %v1073_v5 = vld [vmem:[#allocation6 + $0x18] sm:$0xff]  }
  0x4c   :  { %959 = vmatprep.subr.bf16.mxu1 %v1260_v0  ;;  %975 = vmatprep.mubr.msk.bf16.mxu1 %vm1261_vm0, %v1260_v0  ;;  %v1079_v6 = vld [vmem:[#allocation8 + $0x8] sm:$0xff]   ;;  %v1074_v7 = vld [vmem:[#allocation6 + $0x20] sm:$0xff]   ;;  %v1080_v8 = vld [vmem:[#allocation8 + $0x10] sm:$0xff]  }
  0x4d   :  { %940 = vmatpush3.bf16.msra.mxu0 %v1070_v1  ;;  %960 = vmatpush3.bf16.msra.mxu1 %v1078_v4  ;;  %v1075_v9 = vld [vmem:[#allocation6 + $0x28] sm:$0xff]   ;;  %v1081_v10 = vld [vmem:[#allocation8 + $0x18] sm:$0xff]   ;;  %v1076_v11 = vld [vmem:[#allocation6 + $0x30] sm:$0xff]  }
  0x4e   :  { %941 = vmatprep.subr.bf16.mxu0 %v1260_v0  ;;  %961 = vmatprep.subr.bf16.mxu1 %v1260_v0  ;;  %v1082_v12 = vld [vmem:[#allocation8 + $0x20] sm:$0xff]   ;;  %v1077_v13 = vld [vmem:[#allocation6 + $0x38] sm:$0xff]   ;;  %v90_v14 = vld [vmem:[#allocation3] sm:$0xff] }
  0x4f   :  { %v91_v15 = vld [vmem:[#allocation3 + $0x8] sm:$0xff]  ;;  %v1083_v16 = vld [vmem:[#allocation8 + $0x28] sm:$0xff]   ;;  %v1084_v18 = vld [vmem:[#allocation8 + $0x30] sm:$0xff]  }
  0x50   :  { %v92_v17 = vpack.c.bf16 %v91_v15, %v90_v14  ;;  %v1085_v19 = vld [vmem:[#allocation8 + $0x38] sm:$0xff]   ;;  %v1086_v20 = vld [vmem:[#allocation8 + $0x40] sm:$0xff]   ;;  %v1087_v21 = vld [vmem:[#allocation8 + $0x48] sm:$0xff]  }
  0x51   :  { %942 = vmatpush3.bf16.msra.mxu0 %v1071_v2  ;;  %962 = vmatpush3.bf16.msra.mxu1 %v1079_v6  ;;  %v1088_v22 = vld [vmem:[#allocation8 + $0x50] sm:$0xff]   ;;  %v1089_v23 = vld [vmem:[#allocation8 + $0x58] sm:$0xff]   ;;  %v1090_v32 = vld [vmem:[#allocation8 + $0x60] sm:$0xff]  }
  0x52   :  { %943 = vmatprep.subr.bf16.mxu0 %v1260_v0  ;;  %963 = vmatprep.subr.bf16.mxu1 %v1260_v0  ;;  %v829_v24 = vld [vmem:[%s1478_s2] ss:$0 sm:$0xff]  ;;  %v1091_v33 = vld [vmem:[#allocation8 + $0x68] sm:$0xff]   ;;  %v1093_v35 = vld [vmem:[#allocation8 + $0x78] sm:$0xff]  }
  0x53   :  { %v1092_v34 = vld [vmem:[#allocation8 + $0x70] sm:$0xff]   ;;  %v1094_v36 = vld [vmem:[#allocation8 + $0x80] sm:$0xff]   ;;  %v1095_v37 = vld [vmem:[#allocation8 + $0x88] sm:$0xff]  }
  0x54   :  { %v1096_v38 = vld [vmem:[#allocation8 + $0x90] sm:$0xff]   ;;  %v1097_v49 = vld [vmem:[#allocation8 + $0x98] sm:$0xff]   ;;  %v1098_v50 = vld [vmem:[#allocation8 + $0xa0] sm:$0xff]  }
  0x55   :  { %944 = vmatpush3.bf16.msra.mxu0 %v1072_v3  ;;  %964 = vmatpush3.bf16.msra.mxu1 %v1080_v8  ;;  %v838_v39 = vld [vmem:[%s1480_s4] ss:$0 sm:$0xff]  ;;  %v1099_v51 = vld [vmem:[#allocation8 + $0xa8] sm:$0xff]   ;;  %v1101_v53 = vld [vmem:[#allocation8 + $0xb8] sm:$0xff]  }
  0x56   :  { %945 = vmatprep.subr.bf16.mxu0 %v1260_v0  ;;  %965 = vmatprep.subr.bf16.mxu1 %v1260_v0  ;;  %v1100_v52 = vld [vmem:[#allocation8 + $0xb0] sm:$0xff]   ;;  %v1102_v54 = vld [vmem:[#allocation8 + $0xc0] sm:$0xff]   ;;  %v1103_v55 = vld [vmem:[#allocation8 + $0xc8] sm:$0xff]  }
  0x57   :  { %v1104_v56 = vld [vmem:[#allocation8 + $0xd0] sm:$0xff]   ;;  %v1105_v57 = vld [vmem:[#allocation8 + $0xd8] sm:$0xff]   ;;  %v1107_v8 = vld [vmem:[#allocation8 + $0xe8] sm:$0xff]  }
  0x58   :  { %v847_v58 = vld [vmem:[%s1481_s5] ss:$0 sm:$0xff]  ;;  %v858_v14 = vld [vmem:[%s1480_s4 + $0x1] ss:$0 sm:$0xff] }
  0x59   :  { %946 = vmatpush3.bf16.msra.mxu0 %v1073_v5  ;;  %966 = vmatpush3.bf16.msra.mxu1 %v1081_v10  ;;  %v1109_v10 = vld [vmem:[#allocation8 + $0xf8] sm:$0xff]  }
  0x5a   :  { %947 = vmatprep.subr.bf16.mxu0 %v1260_v0  ;;  %967 = vmatprep.subr.bf16.mxu1 %v1260_v0 }
  0x5d   :  { %948 = vmatpush3.bf16.msra.mxu0 %v1074_v7  ;;  %968 = vmatpush3.bf16.msra.mxu1 %v1082_v12  ;;  %v1106_v7 = vld [vmem:[#allocation8 + $0xe0] sm:$0xff]   ;;  %v1111_v12 = vld [vmem:[#allocation9 + $0x8] sm:$0xff]  }
  0x5e   :  { %949 = vmatprep.subr.bf16.mxu0 %v1260_v0  ;;  %969 = vmatprep.subr.bf16.mxu1 %v1260_v0 }
  0x61   :  { %950 = vmatpush3.bf16.msra.mxu0 %v1075_v9  ;;  %970 = vmatpush3.bf16.msra.mxu1 %v1083_v16  ;;  %v1108_v9 = vld [vmem:[#allocation8 + $0xf0] sm:$0xff]  }
  0x62   :  { %951 = vmatprep.subr.bf16.mxu0 %v1260_v0  ;;  %971 = vmatprep.subr.bf16.mxu1 %v1260_v0 }
  0x65   :  { %952 = vmatpush3.bf16.msra.mxu0 %v1076_v11  ;;  %972 = vmatpush3.bf16.msra.mxu1 %v1084_v18  ;;  %v1110_v11 = vld [vmem:[#allocation9] sm:$0xff]  }
  0x66   :  { %953 = vmatprep.subr.bf16.mxu0 %v1260_v0  ;;  %973 = vmatprep.subr.bf16.mxu1 %v1260_v0 }
  0x69   :  { %954 = vmatpush3.bf16.msra.mxu0 %v1077_v13  ;;  %974 = vmatpush3.bf16.msra.mxu1 %v1085_v19  ;;  %v1112_v13 = vld [vmem:[#allocation9 + $0x10] sm:$0xff]  }
  0x6a   :  { %979 = vmatprep.subr.bf16.mxu0 %v1260_v0  ;;  %999 = vmatprep.subr.bf16.mxu1 %v1260_v0 }
  0x6c   :  { %956 = vmatmul.mubr.bf16.vlgmr.msra.gmra.mrb[0].mxu0 %v92_v17 }
  0x6d   :  { %995 = vmatprep.mubr.msk.bf16.mxu0 %vm1261_vm0, %v1260_v0  ;;  %980 = vmatpush3.bf16.msra.mxu0 %v1086_v20 }
  0x6e   :  { %981 = vmatprep.subr.bf16.mxu0 %v1260_v0 }
  0x71   :  { %982 = vmatpush3.bf16.msra.mxu0 %v1087_v21 }
  0x72   :  { %983 = vmatprep.subr.bf16.mxu0 %v1260_v0 }
  0x75   :  { %984 = vmatpush3.bf16.msra.mxu0 %v1088_v22 }
  0x76   :  { %985 = vmatprep.subr.bf16.mxu0 %v1260_v0 }
  0x79   :  { %986 = vmatpush3.bf16.msra.mxu0 %v1089_v23 }
  0x7a   :  { %987 = vmatprep.subr.bf16.mxu0 %v1260_v0 }
  0x7d   :  { %988 = vmatpush3.bf16.msra.mxu0 %v1090_v32 }
  0x7e   :  { %989 = vmatprep.subr.bf16.mxu0 %v1260_v0 }
  0x81   :  { %990 = vmatpush3.bf16.msra.mxu0 %v1091_v33 }
  0x82   :  { %991 = vmatprep.subr.bf16.mxu0 %v1260_v0 }
  0x85   :  { %992 = vmatpush3.bf16.msra.mxu0 %v1092_v34 }
  0x86   :  { %993 = vmatprep.subr.bf16.mxu0 %v1260_v0 }
  0x89   :  { %994 = vmatpush3.bf16.msra.mxu0 %v1093_v35 }
  0x8a   :  { %1019 = vmatprep.subr.bf16.mxu0 %v1260_v0 }
 0x13f   :  { %v198_v25 = vpop.f32.mrb[0].mxu0 }
 0x140   :  { %v957_v26 = vpop.f32.mrb[1].mxu0  ;;  %v1406_v28 = vadd.f32 %v829_v24, %v198_v25  ;;  %v1114_v25 = vld [vmem:[#allocation9 + $0x20] sm:$0xff]  }
 0x141   :  { %v201_v27 = vpop.f32.mrb[2].mxu0  ;;  %v1115_v26 = vld [vmem:[#allocation9 + $0x28] sm:$0xff]  }
 0x142   :  { %v1408_v29 = vadd.f32 %v829_v24, %v201_v27  ;;  %v958_v30 = vpop.f32.mrb[3].mxu0  ;;  %v1113_v24 = vld [vmem:[#allocation9 + $0x18] sm:$0xff]   ;;  %v1116_v27 = vld [vmem:[#allocation9 + $0x30] sm:$0xff]  }
 0x144   :  { %v247_v31 = vpack.c.bf16 %v1408_v29, %v1406_v28 }
 0x146   :  { %976 = vmatmul.mubr.bf16.vlgmr.msra.gmra.mrb[0].mxu1 %v247_v31 }
 0x147   :  { %1015 = vmatprep.mubr.msk.bf16.mxu1 %vm1261_vm0, %v1260_v0  ;;  %1000 = vmatpush3.bf16.msra.mxu1 %v1094_v36 }
 0x148   :  { %1001 = vmatprep.subr.bf16.mxu1 %v1260_v0 }
 0x14b   :  { %1002 = vmatpush3.bf16.msra.mxu1 %v1095_v37 }
 0x14c   :  { %1003 = vmatprep.subr.bf16.mxu1 %v1260_v0 }
 0x14f   :  { %1004 = vmatpush3.bf16.msra.mxu1 %v1096_v38 }
 0x150   :  { %1005 = vmatprep.subr.bf16.mxu1 %v1260_v0 }
 0x153   :  { %1006 = vmatpush3.bf16.msra.mxu1 %v1097_v49 }
 0x154   :  { %1007 = vmatprep.subr.bf16.mxu1 %v1260_v0 }
 0x157   :  { %1008 = vmatpush3.bf16.msra.mxu1 %v1098_v50 }
 0x158   :  { %1009 = vmatprep.subr.bf16.mxu1 %v1260_v0 }
 0x15b   :  { %1010 = vmatpush3.bf16.msra.mxu1 %v1099_v51 }
 0x15c   :  { %1011 = vmatprep.subr.bf16.mxu1 %v1260_v0 }
 0x15f   :  { %1012 = vmatpush3.bf16.msra.mxu1 %v1100_v52 }
 0x160   :  { %1013 = vmatprep.subr.bf16.mxu1 %v1260_v0 }
 0x163   :  { %1014 = vmatpush3.bf16.msra.mxu1 %v1101_v53 }
 0x164   :  { %1039 = vmatprep.subr.bf16.mxu1 %v1260_v0 }
 0x219   :  { %v336_v40 = vpop.f32.mrb[0].mxu1 }
 0x21a   :  { %v337_v41 = vadd.f32 %v838_v39, %v336_v40  ;;  %v977_v42 = vpop.f32.mrb[1].mxu1 }
 0x21b   :  { %v339_v43 = vpop.f32.mrb[2].mxu1 }
 0x21c   :  { %v340_v44 = vadd.f32 %v838_v39, %v339_v43  ;;  %v978_v45 = vpop.f32.mrb[3].mxu1  ;;  %1118 = vtanh.f32 %v337_v41 }
 0x21e   :  { %1120 = vtanh.f32 %v340_v44 }
 0x226   :  { %v1119_v46 = vpop.eup %1118 }
 0x228   :  { %v1121_v47 = vpop.eup %1120 }
 0x229   :  { %v345_v48 = vpack.c.bf16 %v1121_v47, %v1119_v46 }
 0x22b   :  { %996 = vmatmul.mubr.bf16.vlgmr.msra.gmra.mrb[4].mxu0 %v345_v48 }
 0x22c   :  { %1035 = vmatprep.mubr.msk.bf16.mxu0 %vm1261_vm0, %v1260_v0  ;;  %1020 = vmatpush3.bf16.msra.mxu0 %v1102_v54 }
 0x22d   :  { %1021 = vmatprep.subr.bf16.mxu0 %v1260_v0 }
 0x230   :  { %1022 = vmatpush3.bf16.msra.mxu0 %v1103_v55 }
 0x231   :  { %1023 = vmatprep.subr.bf16.mxu0 %v1260_v0 }
 0x234   :  { %1024 = vmatpush3.bf16.msra.mxu0 %v1104_v56 }
 0x235   :  { %1025 = vmatprep.subr.bf16.mxu0 %v1260_v0 }
 0x238   :  { %1026 = vmatpush3.bf16.msra.mxu0 %v1105_v57 }
 0x239   :  { %1027 = vmatprep.subr.bf16.mxu0 %v1260_v0 }
 0x23c   :  { %1028 = vmatpush3.bf16.msra.mxu0 %v1106_v7 }
 0x23d   :  { %1029 = vmatprep.subr.bf16.mxu0 %v1260_v0 }
 0x240   :  { %1030 = vmatpush3.bf16.msra.mxu0 %v1107_v8 }
 0x241   :  { %1031 = vmatprep.subr.bf16.mxu0 %v1260_v0 }
 0x244   :  { %1032 = vmatpush3.bf16.msra.mxu0 %v1108_v9 }
 0x245   :  { %1033 = vmatprep.subr.bf16.mxu0 %v1260_v0 }
 0x248   :  { %1034 = vmatpush3.bf16.msra.mxu0 %v1109_v10 }
 0x2fe   :  { %v434_v59 = vpop.f32.mrb[4].mxu0 }
 0x2ff   :  { %v435_v60 = vadd.f32 %v847_v58, %v434_v59  ;;  %v997_v61 = vpop.f32.mrb[5].mxu0 }
 0x300   :  { %v437_v62 = vpop.f32.mrb[6].mxu0 }
 0x301   :  { %v441_v63 = vadd.f32 %v435_v60, %v1406_v28  ;;  %v438_v1 = vadd.f32 %v847_v58, %v437_v62  ;;  %v998_v2 = vpop.f32.mrb[7].mxu0  ;;  %v1117_v28 = vld [vmem:[#allocation9 + $0x38] sm:$0xff]  }
 0x303   :  { %v442_v3 = vadd.f32 %v438_v1, %v1408_v29  ;;  %1122 = vtanh.f32 %v441_v63  ;;  %v867_v29 = vld [vmem:[%s1481_s5 + $0x1] ss:$0 sm:$0xff]  ;;  %s1262_s5 = smov [#allocation11]  }
 0x304   :  { %s813_s23 = sshll.u32 %s1262_s5, 4  ;;  %s814_s23 = int_to_ptr.vmem [resolvable:$true] %s813_s23 }
 0x305   :  { %1124 = vtanh.f32 %v442_v3  ;;  %s1222_s0 = scalar_lea.vmem %s814_s23, 256  ;;  %p1227_p5 = scmp.lt.s32.totalorder %s814_s23, %s814_s23 }
 0x306   :  { %p1223_p4 = scmp.ne.s32.totalorder %s814_s23, %s1222_s0  ;;  %p1228_p6 = scmp.lt.s32.totalorder %s1222_s0, %s1222_s0 }
 0x308   :  { %p1229_p7 = por %p1228_p6, %p1227_p5 }
 0x30a   :  { %p1230_p8 = pnand %p1229_p7, %p1223_p4 }
 0x30d   :  { %v1123_v4 = vpop.eup %1122 }
 0x30f   :  { %v1125_v5 = vpop.eup %1124 }
 0x310   :  { %v488_v6 = vpack.c.bf16 %v1125_v5, %v1123_v4 }
 0x312   :  { %1016 = vmatmul.mubr.bf16.vlgmr.msra.gmra.mrb[4].mxu1 %v488_v6 }
 0x313   :  { %1055 = vmatprep.mubr.msk.bf16.mxu1 %vm1261_vm0, %v1260_v0  ;;  %1040 = vmatpush3.bf16.msra.mxu1 %v1110_v11 }
 0x314   :  { %1041 = vmatprep.subr.bf16.mxu1 %v1260_v0 }
 0x317   :  { %1042 = vmatpush3.bf16.msra.mxu1 %v1111_v12 }
 0x318   :  { %1043 = vmatprep.subr.bf16.mxu1 %v1260_v0 }
 0x31b   :  { %1044 = vmatpush3.bf16.msra.mxu1 %v1112_v13 }
 0x31c   :  { %1045 = vmatprep.subr.bf16.mxu1 %v1260_v0 }
 0x31f   :  { %1046 = vmatpush3.bf16.msra.mxu1 %v1113_v24 }
 0x320   :  { %1047 = vmatprep.subr.bf16.mxu1 %v1260_v0 }
 0x323   :  { %1048 = vmatpush3.bf16.msra.mxu1 %v1114_v25 }
 0x324   :  { %1049 = vmatprep.subr.bf16.mxu1 %v1260_v0 }
 0x327   :  { %1050 = vmatpush3.bf16.msra.mxu1 %v1115_v26 }
 0x328   :  { %1051 = vmatprep.subr.bf16.mxu1 %v1260_v0 }
 0x32b   :  { %1052 = vmatpush3.bf16.msra.mxu1 %v1116_v27 }
 0x32c   :  { %1053 = vmatprep.subr.bf16.mxu1 %v1260_v0  ;;  %v876_v0 = vld [vmem:[%s1483_s7] ss:$0 sm:$0xff] }
 0x32f   :  { %1054 = vmatpush3.bf16.msra.mxu1 %v1117_v28 }
 0x3e5   :  { %v577_v15 = vpop.f32.mrb[4].mxu1 }
 0x3e6   :  { %v578_v16 = vadd.f32 %v858_v14, %v577_v15  ;;  %v1017_v17 = vpop.f32.mrb[5].mxu1 }
 0x3e7   :  { %v580_v18 = vpop.f32.mrb[6].mxu1 }
 0x3e8   :  { %v581_v19 = vadd.f32 %v858_v14, %v580_v18  ;;  %v1018_v20 = vpop.f32.mrb[7].mxu1  ;;  %1126 = vtanh.f32 %v578_v16 }
 0x3ea   :  { %1128 = vtanh.f32 %v581_v19 }
 0x3f2   :  { %v1127_v21 = vpop.eup %1126 }
 0x3f4   :  { %v1129_v22 = vpop.eup %1128 }
 0x3f5   :  { %v586_v23 = vpack.c.bf16 %v1129_v22, %v1127_v21 }
 0x3f7   :  { %1036 = vmatmul.mubr.bf16.vlgmr.msra.gmra.mrb[8].mxu0 %v586_v23 }
 0x4ca   :  { %v675_v30 = vpop.f32.mrb[8].mxu0 }
 0x4cb   :  { %v676_v31 = vadd.f32 %v867_v29, %v675_v30  ;;  %v1037_v32 = vpop.f32.mrb[9].mxu0 }
 0x4cc   :  { %v678_v33 = vpop.f32.mrb[10].mxu0 }
 0x4cd   :  { %v682_v34 = vadd.f32 %v1123_v4, %v676_v31  ;;  %v679_v35 = vadd.f32 %v867_v29, %v678_v33  ;;  %v1038_v36 = vpop.f32.mrb[11].mxu0 }
 0x4cf   :  { %v683_v37 = vadd.f32 %v1125_v5, %v679_v35  ;;  %1130 = vtanh.f32 %v682_v34 }
 0x4d1   :  { %1132 = vtanh.f32 %v683_v37 }
 0x4d9   :  { %v1131_v38 = vpop.eup %1130 }
 0x4db   :  { %v1133_v39 = vpop.eup %1132 }
 0x4dc   :  { %v693_v40 = vpack.c.bf16 %v1133_v39, %v1131_v38 }
 0x4de   :  { %1056 = vmatmul.mubr.bf16.vlgmr.msra.gmra.mrb[8].mxu1 %v693_v40 }
 0x5b1   :  { %v799_v41 = vpop.f32.mrb[8].mxu1 }
 0x5b2   :  { %v800_v42 = vadd.f32 %v876_v0, %v799_v41  ;;  %v1057_v43 = vpop.f32.mrb[9].mxu1 }
 0x5b3   :  { %v802_v44 = vpop.f32.mrb[10].mxu1 }
 0x5b4   :  { %806 = vst [vmem:[#allocation11] sm:$0xff] %v800_v42  ;;  %v803_v45 = vadd.f32 %v876_v0, %v802_v44  ;;  %v1058_v46 = vpop.f32.mrb[11].mxu1 }
 0x5b6   :  { %807 = vst [vmem:[#allocation11 + $0x8] sm:$0xff] %v803_v45 }
 0x5b7   :  { %1233 = shalt.err (!%p1230_p8)
}
 0x5b8   :  { %s1234_s24 = scalar_lea.hbm %s1484_s8, 256 }
 0x5b9   :  { %p1235_p9 = scmp.ne.s32.totalorder %s1484_s8, %s1234_s24  ;;  %p1238_p10 = scmp.lt.u32.totalorder %s1234_s24, %s1484_s8 }
 0x5bb   :  { %p1240_p11 = pnand %p1238_p10, %p1235_p9 }
 0x5bd   :  { %1243 = shalt.err (!%p1240_p11)
}
 0x5be   :  { %819 = dma.vmem_to_hbm [thread:$0]  %s814_s23, 256, %s1484_s8, [#allocation5], %s1256_s1, %s1256_s1, %s1257_s28  }
 0x5bf   :  { %1250 = dma.done.wait [#allocation5], 256  }
 0x5c0   :  { %1251 = vsyncadd [#allocation5], 4294967040 }
 0x5c1   :  { %823 = vsyncpa [#allocation4], 1 }
 0x5c2   :  { %824 = vsyncpa [#allocation7], 1 }
 0x5c3   :  { %825 = vsyncpa [#allocation10], 1 }
 0x5c4   :  { %826 = vsyncpa [#allocation5], 1 }

</bundles_post_ra>
